<compile_context>
chip_gen: v5e
topology: v5e:2x2
jax: 0.10.0
libtpu: 0.0.40
codegen_flags: <defaults>
</compile_context>

<pallas_src>
import math

import jax
import jax.numpy as jnp
from jax.experimental import pallas as pl
from jax.experimental.pallas import tpu as pltpu


# ----------------------------------------------------------------------------
# Kernel: fused FeedForward  out = relu(x @ W1_t) @ W2_t
# ----------------------------------------------------------------------------
def ffn_kernel(x_ref, w1_ref, w2_ref, o_ref):
    """x_ref: (tile, D) bf16, w1_ref: (D, H) bf16, w2_ref: (H, D) bf16,
    o_ref: (tile, D) f32.

    Weights are pre-transposed to (in, out) so the kernel computes x @ W
    directly (PyTorch nn.Linear stores (out, in) and computes x @ W^T).
    """
    x = x_ref[...]                                                    # bf16
    # First matmul: bf16 inputs, f32 accumulation on the MXU.
    h = jnp.dot(x, w1_ref[...], preferred_element_type=jnp.float32)  # (tile, H) f32
    # F.relu(h.float()) -> ReLU in f32; ".type_as(x)" -> cast back to the
    # activation dtype (bf16 here) before feeding the second matmul.
    h = jnp.maximum(h, 0.0).astype(jnp.bfloat16)
    out = jnp.dot(h, w2_ref[...], preferred_element_type=jnp.float32)
    o_ref[...] = out.astype(o_ref.dtype)


# ----------------------------------------------------------------------------
# Wrapper
# ----------------------------------------------------------------------------
def feed_forward(x, w1_t, w2_t, *, row_tile=512):
    """x: (B, N, D) f32; w1_t: (D, H); w2_t: (H, D)  ->  (B, N, D) f32."""
    B, N, D = x.shape
    H = w1_t.shape[1]
    M = B * N
    x2 = x.reshape(M, D)

    # bf16 MXU operands (accumulation stays f32 inside the kernel).
    x_bf = x2.astype(jnp.bfloat16)
    w1_bf = w1_t.astype(jnp.bfloat16)
    w2_bf = w2_t.astype(jnp.bfloat16)

    # Tile choice:
    #  * small M: one grid step, rows padded to a sublane multiple (8);
    #  * large M: fixed 512-row tile -> pipelined DMA, bounded VMEM
    #    (~ tile * 3 KiB + weights, well under v7x's 64 MiB core).
    if M <= 512:
        tile = max(8, ((M + 7) // 8) * 8)
    else:
        tile = row_tile
    m_pad = pl.cdiv(M, tile) * tile
    if m_pad != M:
        x_bf = jnp.pad(x_bf, ((0, m_pad - M), (0, 0)))
    grid = (m_pad // tile,)

    # Advisory cost estimate so XLA schedules neighbours sensibly.
    cost = pl.CostEstimate(
        flops=4 * m_pad * D * H,                       # 2*M*D*H per matmul
        transcendentals=0,
        bytes_accessed=m_pad * D * (2 + 4) + (D * H + H * D) * 2,
    )

    out = pl.pallas_call(
        ffn_kernel,
        out_shape=jax.ShapeDtypeStruct((m_pad, D), x.dtype),
        grid=grid,
        in_specs=[
            pl.BlockSpec((tile, D), lambda i: (i, 0)),
            pl.BlockSpec((D, H), lambda i: (0, 0)),    # weights VMEM-resident
            pl.BlockSpec((H, D), lambda i: (0, 0)),
        ],
        out_specs=pl.BlockSpec((tile, D), lambda i: (i, 0)),
        compiler_params=pltpu.CompilerParams(
            dimension_semantics=("parallel",),
            vmem_limit_bytes=64 * 1024 * 1024,
        ),
        cost_estimate=cost,
    )(x_bf, w1_bf, w2_bf)

    if m_pad != M:
        out = out[:M]
    return out.reshape(B, N, D)


# ----------------------------------------------------------------------------
# Parameter init (mimics nn.Linear defaults: U(-1/sqrt(in), 1/sqrt(in)),
# stored (out, in); we return the transpose (in, out)).
# ----------------------------------------------------------------------------
def linear_weight(key, in_dim, out_dim):
    bound = 1.0 / math.sqrt(in_dim)
    w = jax.random.uniform(key, (out_dim, in_dim), jnp.float32, -bound, bound)
    return w.T


def init_params(key, dim, hidden_dim):
    k1, k2 = jax.random.split(key)
    return {
        "w1": linear_weight(k1, dim, hidden_dim),   # (D, H)
        "w2": linear_weight(k2, hidden_dim, dim),   # (H, D)
    }


# ----------------------------------------------------------------------------
if __name__ == "__main__":
    # Small, lane-dense shapes: batch=2, seq=16, dim=128, hidden_dim=256.
    B, N, D, H = 2, 16, 128, 256

    key = jax.random.PRNGKey(0)
    pkey, xkey = jax.random.split(key)
    params = init_params(pkey, dim=D, hidden_dim=H)
    x = jax.random.normal(xkey, (B, N, D), jnp.float32)

    out = jax.jit(feed_forward)(x, params["w1"], params["w2"])
    jax.block_until_ready(out)

    # Reference 1: bf16-operand / f32-accumulation (what the kernel computes).
    xb = x.astype(jnp.bfloat16)
    w1b = params["w1"].astype(jnp.bfloat16)
    w2b = params["w2"].astype(jnp.bfloat16)
    h_b = jnp.dot(xb, w1b, preferred_element_type=jnp.float32)
    h_b = jnp.maximum(h_b, 0.0).astype(jnp.bfloat16)
    ref_b = jnp.dot(h_b, w2b, preferred_element_type=jnp.float32)

    # Reference 2: full f32 PyTorch-equivalent forward.
    h_f = jnp.maximum(
        jnp.dot(x, params["w1"], precision=jax.lax.Precision.HIGHEST), 0.0)
    ref_f = jnp.dot(h_f, params["w2"], precision=jax.lax.Precision.HIGHEST)

    assert out.shape == (B, N, D)
    assert out.dtype == jnp.float32
    assert jnp.allclose(out, ref_b, rtol=1e-3, atol=1e-3)   # matches bf16 math
    assert jnp.allclose(out, ref_f, rtol=5e-2, atol=5e-2)   # bf16-level vs f32
    print("KERNEL_OK")
</pallas_src>

<mosaic_0001>
module attributes {stable_mosaic.version = 11 : i64} {
  func.func @ffn_kernel(%arg0: i32, %arg1: memref<32x128xbf16, #tpu.memory_space<vmem>>, %arg2: memref<128x256xbf16, #tpu.memory_space<vmem>>, %arg3: memref<256x128xbf16, #tpu.memory_space<vmem>>, %arg4: memref<32x128xf32, #tpu.memory_space<vmem>>) attributes {dimension_semantics = [#tpu.dimension_semantics<parallel>], iteration_bounds = array<i64: 1>, scalar_prefetch = 0 : i64, scratch_operands = 0 : i64, tpu.core_type = #tpu.core_type<tc>, window_params = [{transform_indices = @transform_0, window_bounds = array<i64: 32, 128>}, {pipeline_mode = #tpu.pipeline_mode<synchronous>, transform_indices = @transform_1, window_bounds = array<i64: 128, 256>}, {pipeline_mode = #tpu.pipeline_mode<synchronous>, transform_indices = @transform_2, window_bounds = array<i64: 256, 128>}, {transform_indices = @transform_3, window_bounds = array<i64: 32, 128>}]} {
    %c0 = arith.constant 0 : index
    %c0_0 = arith.constant 0 : index
    %0 = vector.load %arg1[%c0, %c0_0] : memref<32x128xbf16, #tpu.memory_space<vmem>>, vector<32x128xbf16>
    %c0_1 = arith.constant 0 : index
    %c0_2 = arith.constant 0 : index
    %1 = vector.load %arg2[%c0_1, %c0_2] : memref<128x256xbf16, #tpu.memory_space<vmem>>, vector<128x256xbf16>
    %cst = arith.constant dense<0.000000e+00> : vector<32x256xf32>
    %2 = tpu.matmul %0, %1, %cst {dimension_numbers = #tpu.dot_dimension_numbers<[1], [0], [0], [1], [0, 0, 1, 1], [], []>} : vector<32x128xbf16>, vector<128x256xbf16>, vector<32x256xf32> -> vector<32x256xf32>
    %cst_3 = arith.constant 0.000000e+00 : f32
    %3 = vector.broadcast %cst_3 : f32 to vector<32x256xf32>
    %4 = arith.maximumf %2, %3 : vector<32x256xf32>
    %5 = arith.truncf %4 : vector<32x256xf32> to vector<32x256xbf16>
    %c0_4 = arith.constant 0 : index
    %c0_5 = arith.constant 0 : index
    %6 = vector.load %arg3[%c0_4, %c0_5] : memref<256x128xbf16, #tpu.memory_space<vmem>>, vector<256x128xbf16>
    %cst_6 = arith.constant dense<0.000000e+00> : vector<32x128xf32>
    %7 = tpu.matmul %5, %6, %cst_6 {dimension_numbers = #tpu.dot_dimension_numbers<[1], [0], [0], [1], [0, 0, 1, 1], [], []>} : vector<32x256xbf16>, vector<256x128xbf16>, vector<32x128xf32> -> vector<32x128xf32>
    %c0_7 = arith.constant 0 : index
    %c0_8 = arith.constant 0 : index
    %8 = vector.load %arg4[%c0_7, %c0_8] : memref<32x128xf32, #tpu.memory_space<vmem>>, vector<32x128xf32>
    tpu.vector_store %arg4[%c0_7, %c0_8], %7 {strides = array<i32>} : memref<32x128xf32, #tpu.memory_space<vmem>>, vector<32x128xf32>,
    return
  }
  func.func @transform_0(%arg0: i32) -> (i32, i32) {
    %c0_i32 = arith.constant 0 : i32
    %c0_i32_0 = arith.constant 0 : i32
    return %arg0, %c0_i32 : i32, i32
  }
  func.func @transform_1(%arg0: i32) -> (i32, i32) {
    %c0_i32 = arith.constant 0 : i32
    %c0_i32_0 = arith.constant 0 : i32
    %c0_i32_1 = arith.constant 0 : i32
    return %c0_i32, %c0_i32_0 : i32, i32
  }
  func.func @transform_2(%arg0: i32) -> (i32, i32) {
    %c0_i32 = arith.constant 0 : i32
    %c0_i32_0 = arith.constant 0 : i32
    %c0_i32_1 = arith.constant 0 : i32
    return %c0_i32, %c0_i32_0 : i32, i32
  }
  func.func @transform_3(%arg0: i32) -> (i32, i32) {
    %c0_i32 = arith.constant 0 : i32
    %c0_i32_0 = arith.constant 0 : i32
    return %arg0, %c0_i32 : i32, i32
  }
}

</mosaic_0001>

<bundles_post_ra>
// kernel: feed_forward.1
= control target key start
LH: loop header
LB: loop body
LE: loop exit
PB: predicated region body
PF: predicated region fallthrough
CT: control target
= control target key end

     0   :  { %s740_s0 = inlined_call_operand.vmem [shape: bf16[32,128], index: 0, kind: input, shape index: {}]   ;;  %s741_s1 = inlined_call_operand.vmem [shape: bf16[128,256], index: 1, kind: input, shape index: {}]   ;;  %s742_s2 = inlined_call_operand.vmem [shape: bf16[256,128], index: 2, kind: input, shape index: {}]   ;;  %s743_s3 = inlined_call_operand.hbm [shape: f32[32,128], index: 3, kind: output, shape index: {}]  }
   0x1   :  { %v431_v0 = vld [vmem:[%s741_s1 + $0x70] sm:$0xf]  ;;  %v518_v1 = vld [vmem:[%s741_s1 + $0x74] sm:$0xf0]  ;;  %v517_v2 = vld [vmem:[%s741_s1 + $0x74] sm:$0xf] }
   0x2   :  { %v432_v3 = vor.u32 %v518_v1, %v431_v0  ;;  %v433_v4 = vld [vmem:[%s741_s1 + $0x78] sm:$0xf0]  ;;  %v423_v5 = vld [vmem:[%s741_s1 + $0x60] sm:$0xf]  ;;  %v516_v6 = vld [vmem:[%s741_s1 + $0x64] sm:$0xf0] }
   0x3   :  { %v436_v7 = vor.u32 %v517_v2, %v433_v4  ;;  %v515_v8 = vld [vmem:[%s741_s1 + $0x64] sm:$0xf]  ;;  %v425_v9 = vld [vmem:[%s741_s1 + $0x68] sm:$0xf0]  ;;  %v424_v10 = vor.u32 %v516_v6, %v423_v5  ;;  %v415_v12 = vld [vmem:[%s741_s1 + $0x50] sm:$0xf] }
   0x4   :  { %127 = vmatpush.bf16.msra.mxu0 %v432_v3  ;;  %v428_v11 = vor.u32 %v515_v8, %v425_v9  ;;  %v514_v13 = vld [vmem:[%s741_s1 + $0x54] sm:$0xf0]  ;;  %v513_v14 = vld [vmem:[%s741_s1 + $0x54] sm:$0xf]  ;;  %v417_v15 = vld [vmem:[%s741_s1 + $0x58] sm:$0xf0] }
   0x5   :  { %146 = vmatpush.bf16.msra.mxu1 %v436_v7  ;;  %v416_v16 = vor.u32 %v514_v13, %v415_v12  ;;  %v420_v17 = vor.u32 %v513_v14, %v417_v15  ;;  %v407_v18 = vld [vmem:[%s741_s1 + $0x40] sm:$0xf]  ;;  %v512_v19 = vld [vmem:[%s741_s1 + $0x44] sm:$0xf0]  ;;  %v511_v20 = vld [vmem:[%s741_s1 + $0x44] sm:$0xf] }
   0x6   :  { %v409_v21 = vld [vmem:[%s741_s1 + $0x48] sm:$0xf0]  ;;  %v408_v22 = vor.u32 %v512_v19, %v407_v18 }
   0x8   :  { %128 = vmatpush.bf16.msra.mxu0 %v424_v10 }
   0x9   :  { %147 = vmatpush.bf16.msra.mxu1 %v428_v11 }
   0xc   :  { %129 = vmatpush.bf16.msra.mxu0 %v416_v16 }
   0xd   :  { %8 = vsyncpa [#allocation3], 0  ;;  %148 = vmatpush.bf16.msra.mxu1 %v420_v17  ;;  %v412_v23 = vor.u32 %v511_v20, %v409_v21  ;;  %v399_v24 = vld [vmem:[%s741_s1 + $0x30] sm:$0xf]  ;;  %v510_v25 = vld [vmem:[%s741_s1 + $0x34] sm:$0xf0] }
   0xe   :  { %v509_v26 = vld [vmem:[%s741_s1 + $0x34] sm:$0xf]  ;;  %v401_v27 = vld [vmem:[%s741_s1 + $0x38] sm:$0xf0]  ;;  %v400_v28 = vor.u32 %v510_v25, %v399_v24  ;;  %v391_v30 = vld [vmem:[%s741_s1 + $0x20] sm:$0xf] }
   0xf   :  { %v404_v29 = vor.u32 %v509_v26, %v401_v27  ;;  %v508_v31 = vld [vmem:[%s741_s1 + $0x24] sm:$0xf0]  ;;  %v507_v32 = vld [vmem:[%s741_s1 + $0x24] sm:$0xf]  ;;  %v393_v33 = vld [vmem:[%s741_s1 + $0x28] sm:$0xf0] }
  0x10   :  { %130 = vmatpush.bf16.msra.mxu0 %v408_v22  ;;  %v392_v34 = vor.u32 %v508_v31, %v391_v30  ;;  %v526_v35 = vld [vmem:[%s742_s2 + $0x38] sm:$0xff]  ;;  %v396_v37 = vor.u32 %v507_v32, %v393_v33  ;;  %v383_v38 = vld [vmem:[%s741_s1 + $0x10] sm:$0xf]  ;;  %v505_v40 = vld [vmem:[%s741_s1 + $0x14] sm:$0xf]  ;;  %s353_s5 = sshll.u32 %s743_s3, 4  ;;  %s354_s5 = int_to_ptr.hbm [resolvable:$true] %s353_s5 }
  0x11   :  { %149 = vmatpush.bf16.msra.mxu1 %v412_v23  ;;  %v534_v36 = vld [vmem:[%s742_s2 + $0x78] sm:$0xff]  ;;  %305 = vmatpush.bf16.msra.mxu2 %v526_v35  ;;  %v525_v42 = vld [vmem:[%s742_s2 + $0x30] sm:$0xff]  ;;  %v375_v46 = vld [vmem:[%s741_s1] sm:$0xf]  ;;  %s565_s6 = smov 128   ;;  %s566_s7 = smov 8  }
  0x12   :  { %v506_v39 = vld [vmem:[%s741_s1 + $0x14] sm:$0xf0]  ;;  %v385_v41 = vld [vmem:[%s741_s1 + $0x18] sm:$0xf0]  ;;  %324 = vmatpush.bf16.msra.mxu3 %v534_v36  ;;  %v533_v43 = vld [vmem:[%s742_s2 + $0x70] sm:$0xff] }
  0x13   :  { %v384_v44 = vor.u32 %v506_v39, %v383_v38  ;;  %v388_v45 = vor.u32 %v505_v40, %v385_v41  ;;  %v504_v47 = vld [vmem:[%s741_s1 + $0x4] sm:$0xf0]  ;;  %v503_v48 = vld [vmem:[%s741_s1 + $0x4] sm:$0xf]  ;;  %v377_v49 = vld [vmem:[%s741_s1 + $0x8] sm:$0xf0] }
  0x14   :  { %131 = vmatpush.bf16.msra.mxu0 %v400_v28  ;;  %v524_v50 = vld [vmem:[%s742_s2 + $0x28] sm:$0xff]  ;;  %v376_v52 = vor.u32 %v504_v47, %v375_v46  ;;  %v380_v53 = vor.u32 %v503_v48, %v377_v49  ;;  %v523_v54 = vld [vmem:[%s742_s2 + $0x20] sm:$0xff]  ;;  %v522_v57 = vld [vmem:[%s742_s2 + $0x18] sm:$0xff] }
  0x15   :  { %150 = vmatpush.bf16.msra.mxu1 %v404_v29  ;;  %306 = vmatpush.bf16.msra.mxu2 %v525_v42  ;;  %v532_v51 = vld [vmem:[%s742_s2 + $0x68] sm:$0xff]  ;;  %v531_v55 = vld [vmem:[%s742_s2 + $0x60] sm:$0xff]  ;;  %v530_v58 = vld [vmem:[%s742_s2 + $0x58] sm:$0xff] }
  0x16   :  { %325 = vmatpush.bf16.msra.mxu3 %v533_v43  ;;  %v501_v56 = vld [vmem:[%s740_s0] sm:$0xff]  ;;  %v502_v59 = vld [vmem:[%s740_s0 + $0x8] sm:$0xff]  ;;  %v521_v60 = vld [vmem:[%s742_s2 + $0x10] sm:$0xff] }
  0x17   :  { %v529_v61 = vld [vmem:[%s742_s2 + $0x50] sm:$0xff]  ;;  %v520_v62 = vld [vmem:[%s742_s2 + $0x8] sm:$0xff]  ;;  %v519_v0 = vld [vmem:[%s742_s2] sm:$0xff] }
  0x18   :  { %132 = vmatpush.bf16.msra.mxu0 %v392_v34  ;;  %v528_v63 = vld [vmem:[%s742_s2 + $0x48] sm:$0xff]  ;;  %v527_v1 = vld [vmem:[%s742_s2 + $0x40] sm:$0xff]  ;;  %s564_s2 = smov [#allocation2]  }
  0x19   :  { %151 = vmatpush.bf16.msra.mxu1 %v396_v37  ;;  %307 = vmatpush.bf16.msra.mxu2 %v524_v50  ;;  %s351_s29 = sshll.u32 %s564_s2, 4  ;;  %s352_s29 = int_to_ptr.vmem [resolvable:$true] %s351_s29 }
  0x1a   :  { %326 = vmatpush.bf16.msra.mxu3 %v532_v51 }
  0x1c   :  { %133 = vmatpush.bf16.msra.mxu0 %v384_v44 }
  0x1d   :  { %152 = vmatpush.bf16.msra.mxu1 %v388_v45  ;;  %308 = vmatpush.bf16.msra.mxu2 %v523_v54 }
  0x1e   :  { %327 = vmatpush.bf16.msra.mxu3 %v531_v55 }
  0x20   :  { %134 = vmatpush.bf16.msra.mxu0 %v376_v52 }
  0x21   :  { %153 = vmatpush.bf16.msra.mxu1 %v380_v53  ;;  %309 = vmatpush.bf16.msra.mxu2 %v522_v57 }
  0x22   :  { %328 = vmatpush.bf16.msra.mxu3 %v530_v58 }
  0x23   :  { %135 = vmatmul.bf16.vlgmr.msra.gmra.mxu0 %v501_v56 }
  0x24   :  { %154 = vmatmul.bf16.vlgmr.msra.gmra.mxu1 %v501_v56 }
  0x25   :  { %310 = vmatpush.bf16.msra.mxu2 %v521_v60 }
  0x26   :  { %329 = vmatpush.bf16.msra.mxu3 %v529_v61 }
  0x29   :  { %311 = vmatpush.bf16.msra.mxu2 %v520_v62 }
  0x2a   :  { %330 = vmatpush.bf16.msra.mxu3 %v528_v63 }
  0x2d   :  { %312 = vmatpush.bf16.msra.mxu2 %v519_v0 }
  0x2e   :  { %331 = vmatpush.bf16.msra.mxu3 %v527_v1 }
  0x33   :  { %140 = vmatmul.bf16.gmra.mxu0 %v502_v59 }
  0x34   :  { %159 = vmatmul.bf16.gmra.mxu1 %v502_v59 }
  0xa0   :  { %v136_v2 = vpop.f32.mrf.mxu0 }
  0xa1   :  { %v155_v3 = vpop.f32.mrf.mxu1  ;;  %v165_v5 = vmax.f32 %v136_v2, 0.0 }
  0xa2   :  { %v166_v8 = vmax.f32 %v155_v3, 0.0 }
  0xa8   :  { %v138_v4 = vpop.f32.mrf.mxu0 }
  0xa9   :  { %v167_v6 = vmax.f32 %v138_v4, 0.0  ;;  %v157_v7 = vpop.f32.mrf.mxu1 }
  0xaa   :  { %v168_v9 = vmax.f32 %v157_v7, 0.0 }
  0xab   :  { %v173_v10 = vpack.c.bf16 %v167_v6, %v165_v5 }
  0xac   :  { %v174_v11 = vpack.c.bf16 %v168_v9, %v166_v8 }
  0xad   :  { %313 = vmatmul.bf16.vlgmr.msra.gmra.mxu2 %v173_v10 }
  0xae   :  { %332 = vmatmul.bf16.vlgmr.msra.gmra.mxu3 %v174_v11 }
  0xb0   :  { %v141_v12 = vpop.f32.mrf.mxu0 }
  0xb1   :  { %v160_v13 = vpop.f32.mrf.mxu1  ;;  %v169_v15 = vmax.f32 %v141_v12, 0.0 }
  0xb2   :  { %v170_v18 = vmax.f32 %v160_v13, 0.0 }
  0xb8   :  { %v143_v14 = vpop.f32.mrf.mxu0 }
  0xb9   :  { %v171_v16 = vmax.f32 %v143_v14, 0.0  ;;  %v162_v17 = vpop.f32.mrf.mxu1 }
  0xba   :  { %v172_v19 = vmax.f32 %v162_v17, 0.0 }
  0xbb   :  { %v175_v20 = vpack.c.bf16 %v171_v16, %v169_v15 }
  0xbc   :  { %v176_v21 = vpack.c.bf16 %v172_v19, %v170_v18 }
  0xbd   :  { %318 = vmatmul.bf16.gmra.mxu2 %v175_v20 }
  0xbe   :  { %337 = vmatmul.bf16.gmra.mxu3 %v176_v21 }
 0x130   :  { %v314_v22 = vpop.f32.mrf.mxu2 }
 0x131   :  { %v333_v23 = vpop.f32.mrf.mxu3 }
 0x132   :  { %v334_v24 = vadd.f32 %v333_v23, %v314_v22 }
 0x134   :  { %343 = vst [vmem:[#allocation2] sm:$0xff] %v334_v24 }
 0x138   :  { %v316_v25 = vpop.f32.mrf.mxu2 }
 0x139   :  { %v335_v26 = vpop.f32.mrf.mxu3 }
 0x13a   :  { %v336_v27 = vadd.f32 %v335_v26, %v316_v25 }
 0x13c   :  { %344 = vst [vmem:[#allocation2 + $0x8] sm:$0xff] %v336_v27 }
 0x140   :  { %v319_v28 = vpop.f32.mrf.mxu2 }
 0x141   :  { %v338_v29 = vpop.f32.mrf.mxu3 }
 0x142   :  { %v339_v30 = vadd.f32 %v338_v29, %v319_v28 }
 0x144   :  { %345 = vst [vmem:[#allocation2 + $0x10] sm:$0xff] %v339_v30 }
 0x148   :  { %v321_v31 = vpop.f32.mrf.mxu2 }
 0x149   :  { %v340_v32 = vpop.f32.mrf.mxu3 }
 0x14a   :  { %v341_v33 = vadd.f32 %v340_v32, %v321_v31 }
 0x14c   :  { %346 = vst [vmem:[#allocation2 + $0x18] sm:$0xff] %v341_v33 }
 0x14d   :  { %359 = dma.vmem_to_hbm [thread:$0]  %s352_s29, 512, %s354_s5, [#allocation3], %s565_s6, %s565_s6, %s566_s7  }
 0x14e   :  { %562 = dma.done.wait [#allocation3], 512  }
 0x14f   :  { %563 = vsyncadd [#allocation3], 4294966784 }
 0x150   :  { %364 = vsyncpa [#allocation3], 1 }

</bundles_post_ra>
